<compile_context>
chip_gen: v5e
topology: v5e:2x2
jax: 0.10.0
libtpu: 0.0.40
codegen_flags: <defaults>
</compile_context>

<pallas_src>
import functools

import jax
import jax.numpy as jnp
from jax import lax
from jax.experimental import pallas as pl
from jax.experimental.pallas import tpu as pltpu


def _round_up(x, m):
    return ((x + m - 1) // m) * m


def _rnn_recurrence_kernel(tt, h0_ref, proj_ref, w_hh_ref, hid_ref, h_ref):
    """One grid step == `tt` RNN time steps (time-blocked serial recurrence).

    h0_ref:   (Bp, Hp)      initial hidden (read only at grid step 0)
    proj_ref: (Tt, Bp, Hp)  precomputed data[t] @ W_dd.T + b_i2h for this block
    w_hh_ref: (Hp, Hp)      transposed, zero-padded hidden->hidden weight
    hid_ref:  (Tt, Bp, Hp)  per-step hidden outputs (lane-dense stores)
    h_ref:    (Bp, Hp)      VMEM scratch carrying the hidden state across steps
    """
    # Seed the recurrent state exactly once.
    @pl.when(pl.program_id(0) == 0)
    def _():
        h_ref[...] = h0_ref[...]

    # Serial dependency chain: one (Bp,Hp)x(Hp,Hp) matmul + one add per step.
    def body(i, carry):
        h = proj_ref[i] + jnp.dot(h_ref[...], w_hh_ref[...],
                                  preferred_element_type=jnp.float32)
        h_ref[...] = h
        hid_ref[i] = h
        return carry

    lax.fori_loop(0, tt, body, 0, unroll=True)   # short fixed trip count


def prepare_rnn_params(w_i2h, b_i2h, w_h2o, b_h2o, data_size):
    """One-time parameter prep (hoisted out of the step path).

    PyTorch Linear stores weight as (out_features, in_features); the forward
    concatenates [data | hidden], so the i2h weight splits column-wise into a
    data block and a hidden block.  Only the recurrent (hidden->hidden) weight
    enters the serial Pallas kernel, zero-padded to full 128-lane tiles.
    """
    H = w_i2h.shape[0]
    O = w_h2o.shape[0]
    D = data_size
    Hp = _round_up(H, 128)

    w_dd_t = jnp.transpose(w_i2h[:, :D])                      # (D, H) data->hid
    w_hh_t = jnp.transpose(w_i2h[:, D:])                      # (H, H) hid->hid
    w_h2o_t = jnp.transpose(w_h2o)                            # (H, O)
    w_hh_p = jnp.zeros((Hp, Hp), jnp.float32).at[:H, :H].set(w_hh_t)

    params = {"w_dd_t": w_dd_t, "w_hh_p": w_hh_p, "b_i2h": b_i2h,
              "w_h2o_t": w_h2o_t, "b_h2o": b_h2o}
    dims = (D, H, O, Hp)
    return params, dims


def rnn_sequence(data_seq, h0, params, dims, *, time_block=32):
    """Run the RNN cell over a whole sequence.

    data_seq: (T, B, D), h0: (B, H).  Returns (hidden_seq (T,B,H),
    output_seq (T,B,O)) — the module forward applied at every step.
    """
    D, H, O, Hp = dims
    T, B, _ = data_seq.shape
    Bp = _round_up(B, 8)

    # ---- hoisted pre-pass (fully parallel, outside the serial kernel) -------
    # proj[t] = data[t] @ W_dd.T + b_i2h as one batched (T*B, D) x (D, H) matmul.
    proj = (data_seq.reshape(T * B, D) @ params["w_dd_t"]
            + params["b_i2h"]).reshape(T, B, H)

    # Lane/sublane/time padding (padding entries are zero and stay zero).
    Tt = max(1, min(time_block, T))
    Tp = _round_up(T, Tt)
    proj_p = jnp.zeros((Tp, Bp, Hp), jnp.float32).at[:T, :B, :H].set(proj)
    h0_p = jnp.zeros((Bp, Hp), jnp.float32).at[:B, :H].set(h0)

    kernel = functools.partial(_rnn_recurrence_kernel, Tt)

    grid_spec = pltpu.PrefetchScalarGridSpec(
        num_scalar_prefetch=0,
        grid=(Tp // Tt,),
        in_specs=[
            pl.BlockSpec((Bp, Hp), lambda t: (0, 0)),          # h0 (invariant)
            pl.BlockSpec((Tt, Bp, Hp), lambda t: (t, 0, 0)),   # proj block
            pl.BlockSpec((Hp, Hp), lambda t: (0, 0)),          # W_hh (invariant)
        ],
        out_specs=pl.BlockSpec((Tt, Bp, Hp), lambda t: (t, 0, 0)),
        scratch_shapes=[pltpu.VMEM((Bp, Hp), jnp.float32)],    # carried hidden
    )

    cost = pl.CostEstimate(
        flops=Tp * 2 * Bp * Hp * Hp,                           # h2h matmuls only
        transcendentals=0,
        bytes_accessed=4 * (Bp * Hp + Hp * Hp + 2 * Tp * Bp * Hp),
    )

    hid_p = pl.pallas_call(
        kernel,
        out_shape=jax.ShapeDtypeStruct((Tp, Bp, Hp), jnp.float32),
        grid_spec=grid_spec,
        compiler_params=pltpu.CompilerParams(
            dimension_semantics=("arbitrary",),    # time axis is sequential
            vmem_limit_bytes=32 * 1024 * 1024,     # safe on v5e/v6e/v7x
        ),
        cost_estimate=cost,
    )(h0_p, proj_p, params["w_hh_p"])

    hid_seq = hid_p[:T, :B, :H]

    # ---- hoisted post-pass (fully parallel, outside the serial kernel) ------
    out_seq = (hid_seq.reshape(T * B, H) @ params["w_h2o_t"]
               + params["b_h2o"]).reshape(T, B, O)
    return hid_seq, out_seq


def rnn_cell(data, last_hidden, params, dims):
    """Exactly the nn.Module forward: (data, last_hidden) -> (hidden, output)."""
    hid_seq, out_seq = rnn_sequence(data[None], last_hidden, params, dims)
    return hid_seq[0], out_seq[0]


def rnn_sequence_ref(data_seq, h0, w_i2h, b_i2h, w_h2o, b_h2o):
    """Pure-JAX reference: the PyTorch forward applied step by step."""
    def step(h, d):
        inp = jnp.concatenate((d, h), axis=1)
        hn = inp @ w_i2h.T + b_i2h
        out = hn @ w_h2o.T + b_h2o
        return hn, (hn, out)

    _, (hs, outs) = jax.lax.scan(step, h0, data_seq)
    return hs, outs


if __name__ == "__main__":
    # Shapes consistent with the module: batch_size=10, hidden_size=20
    # (from the script globals), data_size=16, output_size=16, seq len T=8.
    T, B, D, H, O = 8, 10, 16, 20, 16

    key = jax.random.PRNGKey(0)
    k_d, k_wi, k_bi, k_wo, k_bo = jax.random.split(key, 5)

    data_seq = jax.random.normal(k_d, (T, B, D), dtype=jnp.float32)
    h0 = jnp.zeros((B, H), dtype=jnp.float32)       # torch.zeros(batch, hidden)

    w_i2h = jax.random.normal(k_wi, (H, D + H), dtype=jnp.float32) * 0.1
    b_i2h = jax.random.normal(k_bi, (H,), dtype=jnp.float32) * 0.1
    w_h2o = jax.random.normal(k_wo, (O, H), dtype=jnp.float32) * 0.1
    b_h2o = jax.random.normal(k_bo, (O,), dtype=jnp.float32) * 0.1

    # Weight prep done exactly once (hoisted out of the step path).
    params, dims = prepare_rnn_params(w_i2h, b_i2h, w_h2o, b_h2o, D)

    run_seq = jax.jit(lambda ds, h, p: rnn_sequence(ds, h, p, dims))
    hid_seq, out_seq = run_seq(data_seq, h0, params)
    jax.block_until_ready((hid_seq, out_seq))

    hid_seq_ref, out_seq_ref = rnn_sequence_ref(
        data_seq, h0, w_i2h, b_i2h, w_h2o, b_h2o)
    assert jnp.allclose(hid_seq, hid_seq_ref, atol=1e-4, rtol=1e-4), "hidden mismatch"
    assert jnp.allclose(out_seq, out_seq_ref, atol=1e-4, rtol=1e-4), "output mismatch"

    # Single-step check: exactly the module's forward(data, last_hidden).
    hid1, out1 = rnn_cell(data_seq[0], h0, params, dims)
    inp = jnp.concatenate((data_seq[0], h0), axis=1)
    hid1_ref = inp @ w_i2h.T + b_i2h
    out1_ref = hid1_ref @ w_h2o.T + b_h2o
    assert jnp.allclose(hid1, hid1_ref, atol=1e-4, rtol=1e-4), "cell hidden mismatch"
    assert jnp.allclose(out1, out1_ref, atol=1e-4, rtol=1e-4), "cell output mismatch"

    print("KERNEL_OK")
</pallas_src>

<mosaic_0001>
module attributes {stable_mosaic.version = 11 : i64} {
  func.func @_rnn_recurrence_kernel(%arg0: i32, %arg1: memref<16x128xf32, #tpu.memory_space<vmem>>, %arg2: memref<8x16x128xf32, #tpu.memory_space<vmem>>, %arg3: memref<128x128xf32, #tpu.memory_space<vmem>>, %arg4: memref<8x16x128xf32, #tpu.memory_space<vmem>>, %arg5: memref<16x128xf32, #tpu.memory_space<vmem>>) attributes {dimension_semantics = [#tpu.dimension_semantics<arbitrary>], iteration_bounds = array<i64: 1>, scalar_prefetch = 0 : i64, scratch_operands = 1 : i64, tpu.core_type = #tpu.core_type<tc>, window_params = [{pipeline_mode = #tpu.pipeline_mode<synchronous>, transform_indices = @transform_0, window_bounds = array<i64: 16, 128>}, {transform_indices = @transform_1, window_bounds = array<i64: 8, 16, 128>}, {pipeline_mode = #tpu.pipeline_mode<synchronous>, transform_indices = @transform_2, window_bounds = array<i64: 128, 128>}, {transform_indices = @transform_3, window_bounds = array<i64: 8, 16, 128>}]} {
    %c0_i32 = arith.constant 0 : i32
    %0 = arith.cmpi eq, %arg0, %c0_i32 : i32
    %1 = arith.extui %0 : i1 to i32
    %c0_i32_0 = arith.constant 0 : i32
    %2 = arith.cmpi ne, %1, %c0_i32_0 : i32
    scf.if %2 {
      %c0_88 = arith.constant 0 : index
      %c0_89 = arith.constant 0 : index
      %99 = vector.load %arg1[%c0_88, %c0_89] : memref<16x128xf32, #tpu.memory_space<vmem>>, vector<16x128xf32>
      %c0_90 = arith.constant 0 : index
      %c0_91 = arith.constant 0 : index
      %100 = vector.load %arg5[%c0_90, %c0_91] : memref<16x128xf32, #tpu.memory_space<vmem>>, vector<16x128xf32>
      tpu.vector_store %arg5[%c0_90, %c0_91], %99 {strides = array<i32>} : memref<16x128xf32, #tpu.memory_space<vmem>>, vector<16x128xf32>,
    } else {
    }
    %c0_i32_1 = arith.constant 0 : i32
    %3 = arith.index_cast %c0_i32_1 : i32 to index
    %c0 = arith.constant 0 : index
    %c0_2 = arith.constant 0 : index
    %4 = vector.load %arg2[%3, %c0, %c0_2] : memref<8x16x128xf32, #tpu.memory_space<vmem>>, vector<1x16x128xf32>
    %5 = vector.shape_cast %4 : vector<1x16x128xf32> to vector<16x128xf32>
    %c0_3 = arith.constant 0 : index
    %c0_4 = arith.constant 0 : index
    %6 = vector.load %arg5[%c0_3, %c0_4] : memref<16x128xf32, #tpu.memory_space<vmem>>, vector<16x128xf32>
    %c0_5 = arith.constant 0 : index
    %c0_6 = arith.constant 0 : index
    %7 = vector.load %arg3[%c0_5, %c0_6] : memref<128x128xf32, #tpu.memory_space<vmem>>, vector<128x128xf32>
    %cst = arith.constant dense<0.000000e+00> : vector<16x128xf32>
    %8 = tpu.matmul %6, %7, %cst {dimension_numbers = #tpu.dot_dimension_numbers<[1], [0], [0], [1], [0, 0, 1, 1], [], []>} : vector<16x128xf32>, vector<128x128xf32>, vector<16x128xf32> -> vector<16x128xf32>
    %9 = arith.addf %5, %8 : vector<16x128xf32>
    %c0_7 = arith.constant 0 : index
    %c0_8 = arith.constant 0 : index
    %10 = vector.load %arg5[%c0_7, %c0_8] : memref<16x128xf32, #tpu.memory_space<vmem>>, vector<16x128xf32>
    tpu.vector_store %arg5[%c0_7, %c0_8], %9 {strides = array<i32>} : memref<16x128xf32, #tpu.memory_space<vmem>>, vector<16x128xf32>,
    %11 = arith.index_cast %c0_i32_1 : i32 to index
    %c0_9 = arith.constant 0 : index
    %c0_10 = arith.constant 0 : index
    %12 = vector.load %arg4[%11, %c0_9, %c0_10] : memref<8x16x128xf32, #tpu.memory_space<vmem>>, vector<1x16x128xf32>
    %13 = vector.shape_cast %12 : vector<1x16x128xf32> to vector<16x128xf32>
    %14 = vector.shape_cast %9 : vector<16x128xf32> to vector<1x16x128xf32>
    tpu.vector_store %arg4[%11, %c0_9, %c0_10], %14 {strides = array<i32>} : memref<8x16x128xf32, #tpu.memory_space<vmem>>, vector<1x16x128xf32>,
    %c1_i32 = arith.constant 1 : i32
    %15 = arith.index_cast %c1_i32 : i32 to index
    %c0_11 = arith.constant 0 : index
    %c0_12 = arith.constant 0 : index
    %16 = vector.load %arg2[%15, %c0_11, %c0_12] : memref<8x16x128xf32, #tpu.memory_space<vmem>>, vector<1x16x128xf32>
    %17 = vector.shape_cast %16 : vector<1x16x128xf32> to vector<16x128xf32>
    %c0_13 = arith.constant 0 : index
    %c0_14 = arith.constant 0 : index
    %18 = vector.load %arg5[%c0_13, %c0_14] : memref<16x128xf32, #tpu.memory_space<vmem>>, vector<16x128xf32>
    %c0_15 = arith.constant 0 : index
    %c0_16 = arith.constant 0 : index
    %19 = vector.load %arg3[%c0_15, %c0_16] : memref<128x128xf32, #tpu.memory_space<vmem>>, vector<128x128xf32>
    %cst_17 = arith.constant dense<0.000000e+00> : vector<16x128xf32>
    %20 = tpu.matmul %18, %19, %cst_17 {dimension_numbers = #tpu.dot_dimension_numbers<[1], [0], [0], [1], [0, 0, 1, 1], [], []>} : vector<16x128xf32>, vector<128x128xf32>, vector<16x128xf32> -> vector<16x128xf32>
    %21 = arith.addf %17, %20 : vector<16x128xf32>
    %c0_18 = arith.constant 0 : index
    %c0_19 = arith.constant 0 : index
    %22 = vector.load %arg5[%c0_18, %c0_19] : memref<16x128xf32, #tpu.memory_space<vmem>>, vector<16x128xf32>
    tpu.vector_store %arg5[%c0_18, %c0_19], %21 {strides = array<i32>} : memref<16x128xf32, #tpu.memory_space<vmem>>, vector<16x128xf32>,
    %23 = arith.index_cast %c1_i32 : i32 to index
    %c0_20 = arith.constant 0 : index
    %c0_21 = arith.constant 0 : index
    %24 = vector.load %arg4[%23, %c0_20, %c0_21] : memref<8x16x128xf32, #tpu.memory_space<vmem>>, vector<1x16x128xf32>
    %25 = vector.shape_cast %24 : vector<1x16x128xf32> to vector<16x128xf32>
    %26 = vector.shape_cast %21 : vector<16x128xf32> to vector<1x16x128xf32>
    tpu.vector_store %arg4[%23, %c0_20, %c0_21], %26 {strides = array<i32>} : memref<8x16x128xf32, #tpu.memory_space<vmem>>, vector<1x16x128xf32>,
    %c2_i32 = arith.constant 2 : i32
    %27 = arith.index_cast %c2_i32 : i32 to index
    %c0_22 = arith.constant 0 : index
    %c0_23 = arith.constant 0 : index
    %28 = vector.load %arg2[%27, %c0_22, %c0_23] : memref<8x16x128xf32, #tpu.memory_space<vmem>>, vector<1x16x128xf32>
    %29 = vector.shape_cast %28 : vector<1x16x128xf32> to vector<16x128xf32>
    %c0_24 = arith.constant 0 : index
    %c0_25 = arith.constant 0 : index
    %30 = vector.load %arg5[%c0_24, %c0_25] : memref<16x128xf32, #tpu.memory_space<vmem>>, vector<16x128xf32>
    %c0_26 = arith.constant 0 : index
    %c0_27 = arith.constant 0 : index
    %31 = vector.load %arg3[%c0_26, %c0_27] : memref<128x128xf32, #tpu.memory_space<vmem>>, vector<128x128xf32>
    %cst_28 = arith.constant dense<0.000000e+00> : vector<16x128xf32>
    %32 = tpu.matmul %30, %31, %cst_28 {dimension_numbers = #tpu.dot_dimension_numbers<[1], [0], [0], [1], [0, 0, 1, 1], [], []>} : vector<16x128xf32>, vector<128x128xf32>, vector<16x128xf32> -> vector<16x128xf32>
    %33 = arith.addf %29, %32 : vector<16x128xf32>
    %c0_29 = arith.constant 0 : index
    %c0_30 = arith.constant 0 : index
    %34 = vector.load %arg5[%c0_29, %c0_30] : memref<16x128xf32, #tpu.memory_space<vmem>>, vector<16x128xf32>
    tpu.vector_store %arg5[%c0_29, %c0_30], %33 {strides = array<i32>} : memref<16x128xf32, #tpu.memory_space<vmem>>, vector<16x128xf32>,
    %35 = arith.index_cast %c2_i32 : i32 to index
    %c0_31 = arith.constant 0 : index
    %c0_32 = arith.constant 0 : index
    %36 = vector.load %arg4[%35, %c0_31, %c0_32] : memref<8x16x128xf32, #tpu.memory_space<vmem>>, vector<1x16x128xf32>
    %37 = vector.shape_cast %36 : vector<1x16x128xf32> to vector<16x128xf32>
    %38 = vector.shape_cast %33 : vector<16x128xf32> to vector<1x16x128xf32>
    tpu.vector_store %arg4[%35, %c0_31, %c0_32], %38 {strides = array<i32>} : memref<8x16x128xf32, #tpu.memory_space<vmem>>, vector<1x16x128xf32>,
    %c3_i32 = arith.constant 3 : i32
    %39 = arith.index_cast %c3_i32 : i32 to index
    %c0_33 = arith.constant 0 : index
    %c0_34 = arith.constant 0 : index
    %40 = vector.load %arg2[%39, %c0_33, %c0_34] : memref<8x16x128xf32, #tpu.memory_space<vmem>>, vector<1x16x128xf32>
    %41 = vector.shape_cast %40 : vector<1x16x128xf32> to vector<16x128xf32>
    %c0_35 = arith.constant 0 : index
    %c0_36 = arith.constant 0 : index
    %42 = vector.load %arg5[%c0_35, %c0_36] : memref<16x128xf32, #tpu.memory_space<vmem>>, vector<16x128xf32>
    %c0_37 = arith.constant 0 : index
    %c0_38 = arith.constant 0 : index
    %43 = vector.load %arg3[%c0_37, %c0_38] : memref<128x128xf32, #tpu.memory_space<vmem>>, vector<128x128xf32>
    %cst_39 = arith.constant dense<0.000000e+00> : vector<16x128xf32>
    %44 = tpu.matmul %42, %43, %cst_39 {dimension_numbers = #tpu.dot_dimension_numbers<[1], [0], [0], [1], [0, 0, 1, 1], [], []>} : vector<16x128xf32>, vector<128x128xf32>, vector<16x128xf32> -> vector<16x128xf32>
    %45 = arith.addf %41, %44 : vector<16x128xf32>
    %c0_40 = arith.constant 0 : index
    %c0_41 = arith.constant 0 : index
    %46 = vector.load %arg5[%c0_40, %c0_41] : memref<16x128xf32, #tpu.memory_space<vmem>>, vector<16x128xf32>
    tpu.vector_store %arg5[%c0_40, %c0_41], %45 {strides = array<i32>} : memref<16x128xf32, #tpu.memory_space<vmem>>, vector<16x128xf32>,
    %47 = arith.index_cast %c3_i32 : i32 to index
    %c0_42 = arith.constant 0 : index
    %c0_43 = arith.constant 0 : index
    %48 = vector.load %arg4[%47, %c0_42, %c0_43] : memref<8x16x128xf32, #tpu.memory_space<vmem>>, vector<1x16x128xf32>
    %49 = vector.shape_cast %48 : vector<1x16x128xf32> to vector<16x128xf32>
    %50 = vector.shape_cast %45 : vector<16x128xf32> to vector<1x16x128xf32>
    tpu.vector_store %arg4[%47, %c0_42, %c0_43], %50 {strides = array<i32>} : memref<8x16x128xf32, #tpu.memory_space<vmem>>, vector<1x16x128xf32>,
    %c4_i32 = arith.constant 4 : i32
    %51 = arith.index_cast %c4_i32 : i32 to index
    %c0_44 = arith.constant 0 : index
    %c0_45 = arith.constant 0 : index
    %52 = vector.load %arg2[%51, %c0_44, %c0_45] : memref<8x16x128xf32, #tpu.memory_space<vmem>>, vector<1x16x128xf32>
    %53 = vector.shape_cast %52 : vector<1x16x128xf32> to vector<16x128xf32>
    %c0_46 = arith.constant 0 : index
    %c0_47 = arith.constant 0 : index
    %54 = vector.load %arg5[%c0_46, %c0_47] : memref<16x128xf32, #tpu.memory_space<vmem>>, vector<16x128xf32>
    %c0_48 = arith.constant 0 : index
    %c0_49 = arith.constant 0 : index
    %55 = vector.load %arg3[%c0_48, %c0_49] : memref<128x128xf32, #tpu.memory_space<vmem>>, vector<128x128xf32>
    %cst_50 = arith.constant dense<0.000000e+00> : vector<16x128xf32>
    %56 = tpu.matmul %54, %55, %cst_50 {dimension_numbers = #tpu.dot_dimension_numbers<[1], [0], [0], [1], [0, 0, 1, 1], [], []>} : vector<16x128xf32>, vector<128x128xf32>, vector<16x128xf32> -> vector<16x128xf32>
    %57 = arith.addf %53, %56 : vector<16x128xf32>
    %c0_51 = arith.constant 0 : index
    %c0_52 = arith.constant 0 : index
    %58 = vector.load %arg5[%c0_51, %c0_52] : memref<16x128xf32, #tpu.memory_space<vmem>>, vector<16x128xf32>
    tpu.vector_store %arg5[%c0_51, %c0_52], %57 {strides = array<i32>} : memref<16x128xf32, #tpu.memory_space<vmem>>, vector<16x128xf32>,
    %59 = arith.index_cast %c4_i32 : i32 to index
    %c0_53 = arith.constant 0 : index
    %c0_54 = arith.constant 0 : index
    %60 = vector.load %arg4[%59, %c0_53, %c0_54] : memref<8x16x128xf32, #tpu.memory_space<vmem>>, vector<1x16x128xf32>
    %61 = vector.shape_cast %60 : vector<1x16x128xf32> to vector<16x128xf32>
    %62 = vector.shape_cast %57 : vector<16x128xf32> to vector<1x16x128xf32>
    tpu.vector_store %arg4[%59, %c0_53, %c0_54], %62 {strides = array<i32>} : memref<8x16x128xf32, #tpu.memory_space<vmem>>, vector<1x16x128xf32>,
    %c5_i32 = arith.constant 5 : i32
    %63 = arith.index_cast %c5_i32 : i32 to index
    %c0_55 = arith.constant 0 : index
    %c0_56 = arith.constant 0 : index
    %64 = vector.load %arg2[%63, %c0_55, %c0_56] : memref<8x16x128xf32, #tpu.memory_space<vmem>>, vector<1x16x128xf32>
    %65 = vector.shape_cast %64 : vector<1x16x128xf32> to vector<16x128xf32>
    %c0_57 = arith.constant 0 : index
    %c0_58 = arith.constant 0 : index
    %66 = vector.load %arg5[%c0_57, %c0_58] : memref<16x128xf32, #tpu.memory_space<vmem>>, vector<16x128xf32>
    %c0_59 = arith.constant 0 : index
    %c0_60 = arith.constant 0 : index
    %67 = vector.load %arg3[%c0_59, %c0_60] : memref<128x128xf32, #tpu.memory_space<vmem>>, vector<128x128xf32>
    %cst_61 = arith.constant dense<0.000000e+00> : vector<16x128xf32>
    %68 = tpu.matmul %66, %67, %cst_61 {dimension_numbers = #tpu.dot_dimension_numbers<[1], [0], [0], [1], [0, 0, 1, 1], [], []>} : vector<16x128xf32>, vector<128x128xf32>, vector<16x128xf32> -> vector<16x128xf32>
    %69 = arith.addf %65, %68 : vector<16x128xf32>
    %c0_62 = arith.constant 0 : index
    %c0_63 = arith.constant 0 : index
    %70 = vector.load %arg5[%c0_62, %c0_63] : memref<16x128xf32, #tpu.memory_space<vmem>>, vector<16x128xf32>
    tpu.vector_store %arg5[%c0_62, %c0_63], %69 {strides = array<i32>} : memref<16x128xf32, #tpu.memory_space<vmem>>, vector<16x128xf32>,
    %71 = arith.index_cast %c5_i32 : i32 to index
    %c0_64 = arith.constant 0 : index
    %c0_65 = arith.constant 0 : index
    %72 = vector.load %arg4[%71, %c0_64, %c0_65] : memref<8x16x128xf32, #tpu.memory_space<vmem>>, vector<1x16x128xf32>
    %73 = vector.shape_cast %72 : vector<1x16x128xf32> to vector<16x128xf32>
    %74 = vector.shape_cast %69 : vector<16x128xf32> to vector<1x16x128xf32>
    tpu.vector_store %arg4[%71, %c0_64, %c0_65], %74 {strides = array<i32>} : memref<8x16x128xf32, #tpu.memory_space<vmem>>, vector<1x16x128xf32>,
    %c6_i32 = arith.constant 6 : i32
    %75 = arith.index_cast %c6_i32 : i32 to index
    %c0_66 = arith.constant 0 : index
    %c0_67 = arith.constant 0 : index
    %76 = vector.load %arg2[%75, %c0_66, %c0_67] : memref<8x16x128xf32, #tpu.memory_space<vmem>>, vector<1x16x128xf32>
    %77 = vector.shape_cast %76 : vector<1x16x128xf32> to vector<16x128xf32>
    %c0_68 = arith.constant 0 : index
    %c0_69 = arith.constant 0 : index
    %78 = vector.load %arg5[%c0_68, %c0_69] : memref<16x128xf32, #tpu.memory_space<vmem>>, vector<16x128xf32>
    %c0_70 = arith.constant 0 : index
    %c0_71 = arith.constant 0 : index
    %79 = vector.load %arg3[%c0_70, %c0_71] : memref<128x128xf32, #tpu.memory_space<vmem>>, vector<128x128xf32>
    %cst_72 = arith.constant dense<0.000000e+00> : vector<16x128xf32>
    %80 = tpu.matmul %78, %79, %cst_72 {dimension_numbers = #tpu.dot_dimension_numbers<[1], [0], [0], [1], [0, 0, 1, 1], [], []>} : vector<16x128xf32>, vector<128x128xf32>, vector<16x128xf32> -> vector<16x128xf32>
    %81 = arith.addf %77, %80 : vector<16x128xf32>
    %c0_73 = arith.constant 0 : index
    %c0_74 = arith.constant 0 : index
    %82 = vector.load %arg5[%c0_73, %c0_74] : memref<16x128xf32, #tpu.memory_space<vmem>>, vector<16x128xf32>
    tpu.vector_store %arg5[%c0_73, %c0_74], %81 {strides = array<i32>} : memref<16x128xf32, #tpu.memory_space<vmem>>, vector<16x128xf32>,
    %83 = arith.index_cast %c6_i32 : i32 to index
    %c0_75 = arith.constant 0 : index
    %c0_76 = arith.constant 0 : index
    %84 = vector.load %arg4[%83, %c0_75, %c0_76] : memref<8x16x128xf32, #tpu.memory_space<vmem>>, vector<1x16x128xf32>
    %85 = vector.shape_cast %84 : vector<1x16x128xf32> to vector<16x128xf32>
    %86 = vector.shape_cast %81 : vector<16x128xf32> to vector<1x16x128xf32>
    tpu.vector_store %arg4[%83, %c0_75, %c0_76], %86 {strides = array<i32>} : memref<8x16x128xf32, #tpu.memory_space<vmem>>, vector<1x16x128xf32>,
    %c7_i32 = arith.constant 7 : i32
    %87 = arith.index_cast %c7_i32 : i32 to index
    %c0_77 = arith.constant 0 : index
    %c0_78 = arith.constant 0 : index
    %88 = vector.load %arg2[%87, %c0_77, %c0_78] : memref<8x16x128xf32, #tpu.memory_space<vmem>>, vector<1x16x128xf32>
    %89 = vector.shape_cast %88 : vector<1x16x128xf32> to vector<16x128xf32>
    %c0_79 = arith.constant 0 : index
    %c0_80 = arith.constant 0 : index
    %90 = vector.load %arg5[%c0_79, %c0_80] : memref<16x128xf32, #tpu.memory_space<vmem>>, vector<16x128xf32>
    %c0_81 = arith.constant 0 : index
    %c0_82 = arith.constant 0 : index
    %91 = vector.load %arg3[%c0_81, %c0_82] : memref<128x128xf32, #tpu.memory_space<vmem>>, vector<128x128xf32>
    %cst_83 = arith.constant dense<0.000000e+00> : vector<16x128xf32>
    %92 = tpu.matmul %90, %91, %cst_83 {dimension_numbers = #tpu.dot_dimension_numbers<[1], [0], [0], [1], [0, 0, 1, 1], [], []>} : vector<16x128xf32>, vector<128x128xf32>, vector<16x128xf32> -> vector<16x128xf32>
    %93 = arith.addf %89, %92 : vector<16x128xf32>
    %c0_84 = arith.constant 0 : index
    %c0_85 = arith.constant 0 : index
    %94 = vector.load %arg5[%c0_84, %c0_85] : memref<16x128xf32, #tpu.memory_space<vmem>>, vector<16x128xf32>
    tpu.vector_store %arg5[%c0_84, %c0_85], %93 {strides = array<i32>} : memref<16x128xf32, #tpu.memory_space<vmem>>, vector<16x128xf32>,
    %95 = arith.index_cast %c7_i32 : i32 to index
    %c0_86 = arith.constant 0 : index
    %c0_87 = arith.constant 0 : index
    %96 = vector.load %arg4[%95, %c0_86, %c0_87] : memref<8x16x128xf32, #tpu.memory_space<vmem>>, vector<1x16x128xf32>
    %97 = vector.shape_cast %96 : vector<1x16x128xf32> to vector<16x128xf32>
    %98 = vector.shape_cast %93 : vector<16x128xf32> to vector<1x16x128xf32>
    tpu.vector_store %arg4[%95, %c0_86, %c0_87], %98 {strides = array<i32>} : memref<8x16x128xf32, #tpu.memory_space<vmem>>, vector<1x16x128xf32>,
    %c8_i32 = arith.constant 8 : i32
    return
  }
  func.func @transform_0(%arg0: i32) -> (i32, i32) {
    %c0_i32 = arith.constant 0 : i32
    %c0_i32_0 = arith.constant 0 : i32
    %c0_i32_1 = arith.constant 0 : i32
    return %c0_i32, %c0_i32_0 : i32, i32
  }
  func.func @transform_1(%arg0: i32) -> (i32, i32, i32) {
    %c0_i32 = arith.constant 0 : i32
    %c0_i32_0 = arith.constant 0 : i32
    %c0_i32_1 = arith.constant 0 : i32
    return %arg0, %c0_i32, %c0_i32_0 : i32, i32, i32
  }
  func.func @transform_2(%arg0: i32) -> (i32, i32) {
    %c0_i32 = arith.constant 0 : i32
    %c0_i32_0 = arith.constant 0 : i32
    %c0_i32_1 = arith.constant 0 : i32
    return %c0_i32, %c0_i32_0 : i32, i32
  }
  func.func @transform_3(%arg0: i32) -> (i32, i32, i32) {
    %c0_i32 = arith.constant 0 : i32
    %c0_i32_0 = arith.constant 0 : i32
    %c0_i32_1 = arith.constant 0 : i32
    return %arg0, %c0_i32, %c0_i32_0 : i32, i32, i32
  }
}

</mosaic_0001>

<bundles_post_ra>
// kernel: _lambda_.1
= control target key start
LH: loop header
LB: loop body
LE: loop exit
PB: predicated region body
PF: predicated region fallthrough
CT: control target
= control target key end

     0   :  { %s790_s2 = inlined_call_operand.vmem [shape: f32[128,128], index: 2, kind: input, shape index: {}]   ;;  %s791_s0 = inlined_call_operand.vmem [shape: f32[16,128], index: 0, kind: input, shape index: {}]   ;;  %s792_s1 = inlined_call_operand.vmem [shape: f32[8,16,128], index: 1, kind: input, shape index: {}]   ;;  %s793_s3 = inlined_call_operand.vmem [shape: f32[8,16,128], index: 3, kind: output, shape index: {}]  }
   0x1   :  { %v483_v0 = vld [vmem:[%s790_s2 + $0x78] sm:$0xff]  ;;  %v488_v1 = vld [vmem:[%s790_s2 + $0x70] sm:$0xff]  ;;  %v495_v2 = vld [vmem:[%s790_s2 + $0x68] sm:$0xff] }
   0x2   :  { %42 = vmatpush.msra.mxu0 %v483_v0  ;;  %92 = vmatpush.msra.mxu1 %v483_v0  ;;  %v504_v3 = vld [vmem:[%s790_s2 + $0x60] sm:$0xff]  ;;  %v513_v4 = vld [vmem:[%s790_s2 + $0x58] sm:$0xff]  ;;  %v522_v5 = vld [vmem:[%s790_s2 + $0x50] sm:$0xff] }
   0x3   :  { %143 = vmatpush.msra.mxu2 %v483_v0  ;;  %194 = vmatpush.msra.mxu3 %v483_v0  ;;  %v531_v6 = vld [vmem:[%s790_s2 + $0x48] sm:$0xff]  ;;  %v540_v7 = vld [vmem:[%s790_s2 + $0x40] sm:$0xff]  ;;  %v549_v8 = vld [vmem:[%s790_s2 + $0x38] sm:$0xff] }
   0x4   :  { %43 = vmatpush.msra.mxu0 %v488_v1  ;;  %93 = vmatpush.msra.mxu1 %v488_v1  ;;  %v558_v9 = vld [vmem:[%s790_s2 + $0x30] sm:$0xff]  ;;  %v567_v10 = vld [vmem:[%s790_s2 + $0x28] sm:$0xff]  ;;  %v576_v11 = vld [vmem:[%s790_s2 + $0x20] sm:$0xff] }
   0x5   :  { %144 = vmatpush.msra.mxu2 %v488_v1  ;;  %195 = vmatpush.msra.mxu3 %v488_v1  ;;  %v585_v12 = vld [vmem:[%s790_s2 + $0x18] sm:$0xff]  ;;  %v594_v13 = vld [vmem:[%s790_s2 + $0x10] sm:$0xff]  ;;  %v603_v14 = vld [vmem:[%s790_s2 + $0x8] sm:$0xff] }
   0x6   :  { %44 = vmatpush.msra.mxu0 %v495_v2  ;;  %94 = vmatpush.msra.mxu1 %v495_v2  ;;  %v612_v15 = vld [vmem:[%s790_s2] sm:$0xff]  ;;  %v19_v17 = vld [vmem:[%s791_s0 + $0x8] sm:$0xff]  ;;  %v432_v24 = vld [vmem:[%s792_s1 + $0x10] sm:$0xff] }
   0x7   :  { %145 = vmatpush.msra.mxu2 %v495_v2  ;;  %196 = vmatpush.msra.mxu3 %v495_v2  ;;  %v18_v16 = vld [vmem:[%s791_s0] sm:$0xff]  ;;  %v23_v21 = vld [vmem:[%s792_s1 + $0x8] sm:$0xff]  ;;  %v433_v27 = vld [vmem:[%s792_s1 + $0x18] sm:$0xff] }
   0x8   :  { %45 = vmatpush.msra.mxu0 %v504_v3  ;;  %95 = vmatpush.msra.mxu1 %v504_v3  ;;  %v22_v18 = vld [vmem:[%s792_s1] sm:$0xff]  ;;  %v437_v33 = vld [vmem:[%s792_s1 + $0x28] sm:$0xff]  ;;  %v440_v36 = vld [vmem:[%s792_s1 + $0x30] sm:$0xff] }
   0x9   :  { %146 = vmatpush.msra.mxu2 %v504_v3  ;;  %197 = vmatpush.msra.mxu3 %v504_v3  ;;  %v436_v30 = vld [vmem:[%s792_s1 + $0x20] sm:$0xff]  ;;  %v441_v39 = vld [vmem:[%s792_s1 + $0x38] sm:$0xff]  ;;  %v445_v45 = vld [vmem:[%s792_s1 + $0x48] sm:$0xff] }
   0xa   :  { %46 = vmatpush.msra.mxu0 %v513_v4  ;;  %96 = vmatpush.msra.mxu1 %v513_v4  ;;  %v444_v42 = vld [vmem:[%s792_s1 + $0x40] sm:$0xff]  ;;  %v448_v48 = vld [vmem:[%s792_s1 + $0x50] sm:$0xff]  ;;  %v449_v51 = vld [vmem:[%s792_s1 + $0x58] sm:$0xff] }
   0xb   :  { %147 = vmatpush.msra.mxu2 %v513_v4  ;;  %198 = vmatpush.msra.mxu3 %v513_v4  ;;  %v452_v54 = vld [vmem:[%s792_s1 + $0x60] sm:$0xff]  ;;  %v453_v57 = vld [vmem:[%s792_s1 + $0x68] sm:$0xff]  ;;  %v456_v60 = vld [vmem:[%s792_s1 + $0x70] sm:$0xff] }
   0xc   :  { %47 = vmatpush.msra.mxu0 %v522_v5  ;;  %97 = vmatpush.msra.mxu1 %v522_v5  ;;  %v457_v63 = vld [vmem:[%s792_s1 + $0x78] sm:$0xff] }
   0xd   :  { %148 = vmatpush.msra.mxu2 %v522_v5  ;;  %199 = vmatpush.msra.mxu3 %v522_v5 }
   0xe   :  { %48 = vmatpush.msra.mxu0 %v531_v6  ;;  %98 = vmatpush.msra.mxu1 %v531_v6 }
   0xf   :  { %149 = vmatpush.msra.mxu2 %v531_v6  ;;  %200 = vmatpush.msra.mxu3 %v531_v6 }
  0x10   :  { %49 = vmatpush.msra.mxu0 %v540_v7  ;;  %99 = vmatpush.msra.mxu1 %v540_v7 }
  0x11   :  { %150 = vmatpush.msra.mxu2 %v540_v7  ;;  %201 = vmatpush.msra.mxu3 %v540_v7 }
  0x12   :  { %50 = vmatpush.msra.mxu0 %v549_v8  ;;  %100 = vmatpush.msra.mxu1 %v549_v8 }
  0x13   :  { %151 = vmatpush.msra.mxu2 %v549_v8  ;;  %202 = vmatpush.msra.mxu3 %v549_v8 }
  0x14   :  { %51 = vmatpush.msra.mxu0 %v558_v9  ;;  %101 = vmatpush.msra.mxu1 %v558_v9 }
  0x15   :  { %152 = vmatpush.msra.mxu2 %v558_v9  ;;  %203 = vmatpush.msra.mxu3 %v558_v9 }
  0x16   :  { %52 = vmatpush.msra.mxu0 %v567_v10  ;;  %102 = vmatpush.msra.mxu1 %v567_v10 }
  0x17   :  { %153 = vmatpush.msra.mxu2 %v567_v10  ;;  %204 = vmatpush.msra.mxu3 %v567_v10 }
  0x18   :  { %53 = vmatpush.msra.mxu0 %v576_v11  ;;  %103 = vmatpush.msra.mxu1 %v576_v11 }
  0x19   :  { %154 = vmatpush.msra.mxu2 %v576_v11  ;;  %205 = vmatpush.msra.mxu3 %v576_v11 }
  0x1a   :  { %54 = vmatpush.msra.mxu0 %v585_v12  ;;  %104 = vmatpush.msra.mxu1 %v585_v12 }
  0x1b   :  { %155 = vmatpush.msra.mxu2 %v585_v12  ;;  %206 = vmatpush.msra.mxu3 %v585_v12 }
  0x1c   :  { %55 = vmatpush.msra.mxu0 %v594_v13  ;;  %105 = vmatpush.msra.mxu1 %v594_v13 }
  0x1d   :  { %156 = vmatpush.msra.mxu2 %v594_v13  ;;  %207 = vmatpush.msra.mxu3 %v594_v13 }
  0x1e   :  { %56 = vmatpush.msra.mxu0 %v603_v14  ;;  %106 = vmatpush.msra.mxu1 %v603_v14 }
  0x1f   :  { %157 = vmatpush.msra.mxu2 %v603_v14  ;;  %208 = vmatpush.msra.mxu3 %v603_v14 }
  0x20   :  { %57 = vmatpush.msra.mxu0 %v612_v15  ;;  %107 = vmatpush.msra.mxu1 %v612_v15 }
  0x21   :  { %58 = vmatmul.f32.vlgmr.msra.gmra.mxu0 %v18_v16  ;;  %158 = vmatpush.msra.mxu2 %v612_v15 }
  0x22   :  { %209 = vmatpush.msra.mxu3 %v612_v15  ;;  %245 = vmatpush.msrb.mxu0 %v483_v0 }
  0x23   :  { %296 = vmatpush.msrb.mxu1 %v483_v0  ;;  %347 = vmatpush.msrb.mxu2 %v483_v0 }
  0x24   :  { %246 = vmatpush.msrb.mxu0 %v488_v1  ;;  %398 = vmatpush.msrb.mxu3 %v483_v0 }
  0x25   :  { %297 = vmatpush.msrb.mxu1 %v488_v1  ;;  %348 = vmatpush.msrb.mxu2 %v488_v1 }
  0x26   :  { %247 = vmatpush.msrb.mxu0 %v495_v2  ;;  %399 = vmatpush.msrb.mxu3 %v488_v1 }
  0x27   :  { %298 = vmatpush.msrb.mxu1 %v495_v2  ;;  %349 = vmatpush.msrb.mxu2 %v495_v2 }
  0x28   :  { %248 = vmatpush.msrb.mxu0 %v504_v3  ;;  %400 = vmatpush.msrb.mxu3 %v495_v2 }
  0x29   :  { %61 = vmatmul.f32.gmra.mxu0 %v19_v17  ;;  %299 = vmatpush.msrb.mxu1 %v504_v3 }
  0x2a   :  { %249 = vmatpush.msrb.mxu0 %v513_v4  ;;  %350 = vmatpush.msrb.mxu2 %v504_v3 }
  0x2b   :  { %300 = vmatpush.msrb.mxu1 %v513_v4  ;;  %401 = vmatpush.msrb.mxu3 %v504_v3 }
  0x2c   :  { %250 = vmatpush.msrb.mxu0 %v522_v5  ;;  %351 = vmatpush.msrb.mxu2 %v513_v4 }
  0x2d   :  { %301 = vmatpush.msrb.mxu1 %v522_v5  ;;  %402 = vmatpush.msrb.mxu3 %v513_v4 }
  0x2e   :  { %251 = vmatpush.msrb.mxu0 %v531_v6  ;;  %352 = vmatpush.msrb.mxu2 %v522_v5 }
  0x2f   :  { %302 = vmatpush.msrb.mxu1 %v531_v6  ;;  %403 = vmatpush.msrb.mxu3 %v522_v5 }
  0x30   :  { %252 = vmatpush.msrb.mxu0 %v540_v7  ;;  %353 = vmatpush.msrb.mxu2 %v531_v6 }
  0x31   :  { %303 = vmatpush.msrb.mxu1 %v540_v7  ;;  %404 = vmatpush.msrb.mxu3 %v531_v6 }
  0x32   :  { %253 = vmatpush.msrb.mxu0 %v549_v8  ;;  %354 = vmatpush.msrb.mxu2 %v540_v7 }
  0x33   :  { %304 = vmatpush.msrb.mxu1 %v549_v8  ;;  %405 = vmatpush.msrb.mxu3 %v540_v7 }
  0x34   :  { %254 = vmatpush.msrb.mxu0 %v558_v9  ;;  %355 = vmatpush.msrb.mxu2 %v549_v8 }
  0x35   :  { %305 = vmatpush.msrb.mxu1 %v558_v9  ;;  %406 = vmatpush.msrb.mxu3 %v549_v8 }
  0x36   :  { %255 = vmatpush.msrb.mxu0 %v567_v10  ;;  %356 = vmatpush.msrb.mxu2 %v558_v9 }
  0x37   :  { %306 = vmatpush.msrb.mxu1 %v567_v10  ;;  %407 = vmatpush.msrb.mxu3 %v558_v9 }
  0x38   :  { %256 = vmatpush.msrb.mxu0 %v576_v11  ;;  %357 = vmatpush.msrb.mxu2 %v567_v10 }
  0x39   :  { %307 = vmatpush.msrb.mxu1 %v576_v11  ;;  %408 = vmatpush.msrb.mxu3 %v567_v10 }
  0x3a   :  { %257 = vmatpush.msrb.mxu0 %v585_v12  ;;  %358 = vmatpush.msrb.mxu2 %v576_v11 }
  0x3b   :  { %308 = vmatpush.msrb.mxu1 %v585_v12  ;;  %409 = vmatpush.msrb.mxu3 %v576_v11 }
  0x3c   :  { %258 = vmatpush.msrb.mxu0 %v594_v13  ;;  %359 = vmatpush.msrb.mxu2 %v585_v12 }
  0x3d   :  { %309 = vmatpush.msrb.mxu1 %v594_v13  ;;  %410 = vmatpush.msrb.mxu3 %v585_v12 }
  0x3e   :  { %259 = vmatpush.msrb.mxu0 %v603_v14  ;;  %360 = vmatpush.msrb.mxu2 %v594_v13 }
  0x3f   :  { %310 = vmatpush.msrb.mxu1 %v603_v14  ;;  %411 = vmatpush.msrb.mxu3 %v594_v13 }
  0x40   :  { %260 = vmatpush.msrb.mxu0 %v612_v15  ;;  %361 = vmatpush.msrb.mxu2 %v603_v14 }
  0x41   :  { %311 = vmatpush.msrb.mxu1 %v612_v15  ;;  %412 = vmatpush.msrb.mxu3 %v603_v14 }
  0x42   :  { %362 = vmatpush.msrb.mxu2 %v612_v15 }
  0x43   :  { %413 = vmatpush.msrb.mxu3 %v612_v15 }
  0x9e   :  { %v59_v19 = vpop.f32.mrf.mxu0 }
  0x9f   :  { %v65_v20 = vadd.f32 %v59_v19, %v22_v18 }
  0xa1   :  { %69 = vst [vmem:[%s793_s3] sm:$0xff] %v65_v20  ;;  %108 = vmatmul.f32.vlgmr.msra.gmra.mxu1 %v65_v20 }
  0xa6   :  { %v62_v22 = vpop.f32.mrf.mxu0 }
  0xa7   :  { %v66_v23 = vadd.f32 %v62_v22, %v23_v21 }
  0xa9   :  { %70 = vst [vmem:[%s793_s3 + $0x8] sm:$0xff] %v66_v23  ;;  %111 = vmatmul.f32.gmra.mxu1 %v66_v23 }
 0x11e   :  { %v109_v25 = vpop.f32.mrf.mxu1 }
 0x11f   :  { %v115_v26 = vadd.f32 %v432_v24, %v109_v25 }
 0x121   :  { %434 = vst [vmem:[%s793_s3 + $0x10] sm:$0xff] %v115_v26  ;;  %159 = vmatmul.f32.vlgmr.msra.gmra.mxu2 %v115_v26 }
 0x126   :  { %v112_v28 = vpop.f32.mrf.mxu1 }
 0x127   :  { %v116_v29 = vadd.f32 %v433_v27, %v112_v28 }
 0x129   :  { %435 = vst [vmem:[%s793_s3 + $0x18] sm:$0xff] %v116_v29  ;;  %162 = vmatmul.f32.gmra.mxu2 %v116_v29 }
 0x1a4   :  { %v160_v31 = vpop.f32.mrf.mxu2 }
 0x1a5   :  { %v166_v32 = vadd.f32 %v436_v30, %v160_v31 }
 0x1a7   :  { %438 = vst [vmem:[%s793_s3 + $0x20] sm:$0xff] %v166_v32  ;;  %210 = vmatmul.f32.vlgmr.msra.gmra.mxu3 %v166_v32 }
 0x1ac   :  { %v163_v34 = vpop.f32.mrf.mxu2 }
 0x1ad   :  { %v167_v35 = vadd.f32 %v437_v33, %v163_v34 }
 0x1af   :  { %439 = vst [vmem:[%s793_s3 + $0x28] sm:$0xff] %v167_v35  ;;  %213 = vmatmul.f32.gmra.mxu3 %v167_v35 }
 0x22a   :  { %v211_v37 = vpop.f32.mrf.mxu3 }
 0x22b   :  { %v217_v38 = vadd.f32 %v440_v36, %v211_v37 }
 0x22d   :  { %442 = vst [vmem:[%s793_s3 + $0x30] sm:$0xff] %v217_v38  ;;  %261 = vmatmul.f32.vlgmr.msrb.gmra.mxu0 %v217_v38 }
 0x232   :  { %v214_v40 = vpop.f32.mrf.mxu3 }
 0x233   :  { %v218_v41 = vadd.f32 %v441_v39, %v214_v40 }
 0x235   :  { %443 = vst [vmem:[%s793_s3 + $0x38] sm:$0xff] %v218_v41  ;;  %264 = vmatmul.f32.gmra.mxu0 %v218_v41 }
 0x2aa   :  { %v262_v43 = vpop.f32.mrf.mxu0 }
 0x2ab   :  { %v268_v44 = vadd.f32 %v444_v42, %v262_v43 }
 0x2ad   :  { %446 = vst [vmem:[%s793_s3 + $0x40] sm:$0xff] %v268_v44  ;;  %312 = vmatmul.f32.vlgmr.msrb.gmra.mxu1 %v268_v44 }
 0x2b2   :  { %v265_v46 = vpop.f32.mrf.mxu0 }
 0x2b3   :  { %v269_v47 = vadd.f32 %v445_v45, %v265_v46 }
 0x2b5   :  { %447 = vst [vmem:[%s793_s3 + $0x48] sm:$0xff] %v269_v47  ;;  %315 = vmatmul.f32.gmra.mxu1 %v269_v47 }
 0x32a   :  { %v313_v49 = vpop.f32.mrf.mxu1 }
 0x32b   :  { %v319_v50 = vadd.f32 %v448_v48, %v313_v49 }
 0x32d   :  { %450 = vst [vmem:[%s793_s3 + $0x50] sm:$0xff] %v319_v50  ;;  %363 = vmatmul.f32.vlgmr.msrb.gmra.mxu2 %v319_v50 }
 0x332   :  { %v316_v52 = vpop.f32.mrf.mxu1 }
 0x333   :  { %v320_v53 = vadd.f32 %v449_v51, %v316_v52 }
 0x335   :  { %451 = vst [vmem:[%s793_s3 + $0x58] sm:$0xff] %v320_v53  ;;  %366 = vmatmul.f32.gmra.mxu2 %v320_v53 }
 0x3b0   :  { %v364_v55 = vpop.f32.mrf.mxu2 }
 0x3b1   :  { %v370_v56 = vadd.f32 %v452_v54, %v364_v55 }
 0x3b3   :  { %454 = vst [vmem:[%s793_s3 + $0x60] sm:$0xff] %v370_v56  ;;  %414 = vmatmul.f32.vlgmr.msrb.gmra.mxu3 %v370_v56 }
 0x3b8   :  { %v367_v58 = vpop.f32.mrf.mxu2 }
 0x3b9   :  { %v371_v59 = vadd.f32 %v453_v57, %v367_v58 }
 0x3bb   :  { %455 = vst [vmem:[%s793_s3 + $0x68] sm:$0xff] %v371_v59  ;;  %417 = vmatmul.f32.gmra.mxu3 %v371_v59 }
 0x436   :  { %v415_v61 = vpop.f32.mrf.mxu3 }
 0x437   :  { %v421_v62 = vadd.f32 %v456_v60, %v415_v61 }
 0x439   :  { %458 = vst [vmem:[%s793_s3 + $0x70] sm:$0xff] %v421_v62 }
 0x43e   :  { %v418_v0 = vpop.f32.mrf.mxu3 }
 0x43f   :  { %v422_v1 = vadd.f32 %v457_v63, %v418_v0 }
 0x441   :  { %459 = vst [vmem:[%s793_s3 + $0x78] sm:$0xff] %v422_v1 }

</bundles_post_ra>
